<compile_context>
chip_gen: v7x
topology: tpu7x:2x2x1
jax: 0.10.0
libtpu: 0.0.40
codegen_flags: <defaults>
</compile_context>

<pallas_src>
import numpy as np
import jax
import jax.numpy as jnp
from jax.experimental import pallas as pl
from jax.experimental.pallas import tpu as pltpu

N = 16                       # number of graph nodes
F_IN, HID, F_OUT = 1, 10, 1
LANES = 128                  # lane padding for the output-feature dim
Z1_W = 16                    # sublane-padded contraction width for layer 2 (>= HID)


def gnn_kernel(a_ref, x_ref, w1s_ref, w1n_ref, b1_ref, w2s_ref, w2n_ref, b2_ref, o_ref):
    A = a_ref[...]                                   # (N, N)  in-degree-normalized weighted adj
    x = x_ref[...]                                   # (N, 1)  raw feature column

    # ---- Layer 1: SAGEConv(1 -> 10, 'mean') -------------------------------------------
    #   x @ Ws1 + (A @ x) @ Wn1 + b1  ==  x * ws1_row + A @ (x * wn1_row) + b1
    # (rank-1 fold: broadcast multiplies on the VPU, one lane-full MXU dot)
    xw_n = x * w1n_ref[...]                          # (N, 128) broadcast
    h1 = jax.nn.sigmoid(
        x * w1s_ref[...]
        + jnp.dot(A, xw_n, preferred_element_type=jnp.float32)
        + b1_ref[...])                               # (N, 128); lanes >= HID hold 0.5 (harmless)

    # ---- Layer 2: SAGEConv(10 -> 1, 'mean') --------------------------------------------
    h = h1[:, 0:Z1_W]                                # (N, 16) static lane slice (in registers)
    ah = jnp.dot(A, h, preferred_element_type=jnp.float32)           # (N, 16)
    o_ref[...] = (jnp.dot(h, w2s_ref[...], preferred_element_type=jnp.float32)
                  + jnp.dot(ah, w2n_ref[...], preferred_element_type=jnp.float32)
                  + b2_ref[...])                     # (N, 128) lane-dense unmasked store


def prepare_params(params):
    """One-time host-side padding: each weight is its own sublane/lane-padded tile.
    Rows >= HID of the layer-2 tiles stay zero so the 0.5-valued padded lanes of h1
    are annihilated (invariant carried over from the packed layout)."""
    ws1, wn1, b1, ws2, wn2, b2 = (np.asarray(p, np.float32) for p in params)

    w1s = np.zeros((F_IN, LANES), np.float32); w1s[:, :HID] = ws1     # (1, 128)
    w1n = np.zeros((F_IN, LANES), np.float32); w1n[:, :HID] = wn1     # (1, 128)
    b1p = np.zeros((1, LANES), np.float32);    b1p[0, :HID] = b1

    w2s = np.zeros((Z1_W, LANES), np.float32); w2s[:HID, :F_OUT] = ws2   # (16, 128)
    w2n = np.zeros((Z1_W, LANES), np.float32); w2n[:HID, :F_OUT] = wn2   # (16, 128)
    b2p = np.zeros((1, LANES), np.float32);    b2p[0, :F_OUT] = b2

    return tuple(jnp.asarray(a) for a in (w1s, w1n, b1p, w2s, w2n, b2p))


def gnn_forward(A, x, packed):
    """A: (N,N) dense normalized adjacency; x: (N,1) node features -> (N,1)."""
    vmem = pl.BlockSpec(memory_space=pltpu.MemorySpace.VMEM)
    out = pl.pallas_call(
        gnn_kernel,
        out_shape=jax.ShapeDtypeStruct((N, LANES), jnp.float32),
        in_specs=[vmem] * 8,
        out_specs=vmem,
    )(A, x, *packed)
    return out[:, :F_OUT]


def gnn_reference(A, x, params):
    ws1, wn1, b1, ws2, wn2, b2 = params
    h1 = jax.nn.sigmoid(x @ ws1 + (A @ x) @ wn1 + b1)
    return h1 @ ws2 + (A @ h1) @ wn2 + b2


def build_graph(key):
    """Deterministic small graph: bidirectional ring + skip edges, positive edge weights.
    Normalization divides by in-degree by EDGE COUNT (DGL 'mean' with edge_weight),
    not by the sum of edge weights."""
    idx = np.arange(N)
    src = np.concatenate([idx, (idx + 1) % N, idx])
    dst = np.concatenate([(idx + 1) % N, idx, (idx + 3) % N])
    E = src.shape[0]
    e_feat = jax.random.uniform(key, (E, 1), jnp.float32, 0.1, 1.0)   # edge 'weight' feature

    Wsum = jnp.zeros((N, N), jnp.float32).at[dst, src].add(e_feat[:, 0])
    deg = jnp.zeros((N,), jnp.float32).at[jnp.asarray(dst)].add(1.0)
    A = Wsum / jnp.maximum(deg, 1.0)[:, None]
    return A, e_feat


def init_params(key):
    k = jax.random.split(key, 6)
    ws1 = jax.random.normal(k[0], (F_IN, HID), jnp.float32) * 0.5   # fc_self  layer1 (with bias)
    wn1 = jax.random.normal(k[1], (F_IN, HID), jnp.float32) * 0.5   # fc_neigh layer1 (no bias)
    b1 = jax.random.normal(k[2], (HID,), jnp.float32) * 0.1
    ws2 = jax.random.normal(k[3], (HID, F_OUT), jnp.float32) * 0.5  # fc_self  layer2 (with bias)
    wn2 = jax.random.normal(k[4], (HID, F_OUT), jnp.float32) * 0.5  # fc_neigh layer2 (no bias)
    b2 = jax.random.normal(k[5], (F_OUT,), jnp.float32) * 0.1
    return (ws1, wn1, b1, ws2, wn2, b2)


if __name__ == "__main__":
    root = jax.random.PRNGKey(0)
    k_graph, k_feat, k_param = jax.random.split(root, 3)

    A, e_feat = build_graph(k_graph)
    in_feat = jax.random.normal(k_feat, (N, F_IN), jnp.float32)   # graph.ndata['assets'].reshape(-1, 1)
    params = init_params(k_param)
    packed = prepare_params(params)          # all padding hoisted out of the call path

    out = gnn_forward(A, in_feat, packed)
    out = jax.block_until_ready(out)

    ref = gnn_reference(A, in_feat, params)
    assert out.shape == (N, F_OUT)
    np.testing.assert_allclose(np.asarray(out), np.asarray(ref), rtol=1e-5, atol=1e-5)
    print("KERNEL_OK")
</pallas_src>

<mosaic_0001>
module attributes {stable_mosaic.version = 11 : i64} {
  func.func @gnn_kernel(%arg0: memref<16x16xf32, #tpu.memory_space<vmem>>, %arg1: memref<16x1xf32, #tpu.memory_space<vmem>>, %arg2: memref<1x128xf32, #tpu.memory_space<vmem>>, %arg3: memref<1x128xf32, #tpu.memory_space<vmem>>, %arg4: memref<1x128xf32, #tpu.memory_space<vmem>>, %arg5: memref<16x128xf32, #tpu.memory_space<vmem>>, %arg6: memref<16x128xf32, #tpu.memory_space<vmem>>, %arg7: memref<1x128xf32, #tpu.memory_space<vmem>>, %arg8: memref<16x128xf32, #tpu.memory_space<vmem>>) attributes {dimension_semantics = [], scalar_prefetch = 0 : i64, scratch_operands = 0 : i64, tpu.core_type = #tpu.core_type<tc>} {
    %c0 = arith.constant 0 : index
    %c0_0 = arith.constant 0 : index
    %0 = vector.load %arg0[%c0, %c0_0] : memref<16x16xf32, #tpu.memory_space<vmem>>, vector<16x16xf32>
    %c0_1 = arith.constant 0 : index
    %c0_2 = arith.constant 0 : index
    %1 = vector.load %arg1[%c0_1, %c0_2] : memref<16x1xf32, #tpu.memory_space<vmem>>, vector<16x1xf32>
    %c0_3 = arith.constant 0 : index
    %c0_4 = arith.constant 0 : index
    %2 = vector.load %arg3[%c0_3, %c0_4] : memref<1x128xf32, #tpu.memory_space<vmem>>, vector<1x128xf32>
    %3 = vector.broadcast %1 : vector<16x1xf32> to vector<16x128xf32>
    %4 = vector.broadcast %2 : vector<1x128xf32> to vector<16x128xf32>
    %5 = arith.mulf %3, %4 : vector<16x128xf32>
    %c0_5 = arith.constant 0 : index
    %c0_6 = arith.constant 0 : index
    %6 = vector.load %arg2[%c0_5, %c0_6] : memref<1x128xf32, #tpu.memory_space<vmem>>, vector<1x128xf32>
    %7 = vector.broadcast %1 : vector<16x1xf32> to vector<16x128xf32>
    %8 = vector.broadcast %6 : vector<1x128xf32> to vector<16x128xf32>
    %9 = arith.mulf %7, %8 : vector<16x128xf32>
    %cst = arith.constant dense<0.000000e+00> : vector<16x128xf32>
    %10 = tpu.matmul %0, %5, %cst {dimension_numbers = #tpu.dot_dimension_numbers<[1], [0], [0], [1], [0, 0, 1, 1], [], []>} : vector<16x16xf32>, vector<16x128xf32>, vector<16x128xf32> -> vector<16x128xf32>
    %11 = arith.addf %9, %10 : vector<16x128xf32>
    %c0_7 = arith.constant 0 : index
    %c0_8 = arith.constant 0 : index
    %12 = vector.load %arg4[%c0_7, %c0_8] : memref<1x128xf32, #tpu.memory_space<vmem>>, vector<1x128xf32>
    %13 = vector.broadcast %12 : vector<1x128xf32> to vector<16x128xf32>
    %14 = arith.addf %11, %13 : vector<16x128xf32>
    %15 = arith.negf %14 : vector<16x128xf32>
    %16 = math.exp %15 : vector<16x128xf32>
    %cst_9 = arith.constant 1.000000e+00 : f32
    %17 = vector.broadcast %cst_9 : f32 to vector<16x128xf32>
    %18 = arith.addf %17, %16 : vector<16x128xf32>
    %19 = arith.divf %17, %18 : vector<16x128xf32>
    %20 = vector.extract_strided_slice %19 {offsets = [0, 0], sizes = [16, 16], strides = [1, 1]} : vector<16x128xf32> to vector<16x16xf32>
    %cst_10 = arith.constant dense<0.000000e+00> : vector<16x16xf32>
    %21 = tpu.matmul %0, %20, %cst_10 {dimension_numbers = #tpu.dot_dimension_numbers<[1], [0], [0], [1], [0, 0, 1, 1], [], []>} : vector<16x16xf32>, vector<16x16xf32>, vector<16x16xf32> -> vector<16x16xf32>
    %c0_11 = arith.constant 0 : index
    %c0_12 = arith.constant 0 : index
    %22 = vector.load %arg5[%c0_11, %c0_12] : memref<16x128xf32, #tpu.memory_space<vmem>>, vector<16x128xf32>
    %cst_13 = arith.constant dense<0.000000e+00> : vector<16x128xf32>
    %23 = tpu.matmul %20, %22, %cst_13 {dimension_numbers = #tpu.dot_dimension_numbers<[1], [0], [0], [1], [0, 0, 1, 1], [], []>} : vector<16x16xf32>, vector<16x128xf32>, vector<16x128xf32> -> vector<16x128xf32>
    %c0_14 = arith.constant 0 : index
    %c0_15 = arith.constant 0 : index
    %24 = vector.load %arg6[%c0_14, %c0_15] : memref<16x128xf32, #tpu.memory_space<vmem>>, vector<16x128xf32>
    %cst_16 = arith.constant dense<0.000000e+00> : vector<16x128xf32>
    %25 = tpu.matmul %21, %24, %cst_16 {dimension_numbers = #tpu.dot_dimension_numbers<[1], [0], [0], [1], [0, 0, 1, 1], [], []>} : vector<16x16xf32>, vector<16x128xf32>, vector<16x128xf32> -> vector<16x128xf32>
    %26 = arith.addf %23, %25 : vector<16x128xf32>
    %c0_17 = arith.constant 0 : index
    %c0_18 = arith.constant 0 : index
    %27 = vector.load %arg7[%c0_17, %c0_18] : memref<1x128xf32, #tpu.memory_space<vmem>>, vector<1x128xf32>
    %28 = vector.broadcast %27 : vector<1x128xf32> to vector<16x128xf32>
    %29 = arith.addf %26, %28 : vector<16x128xf32>
    %c0_19 = arith.constant 0 : index
    %c0_20 = arith.constant 0 : index
    %30 = vector.load %arg8[%c0_19, %c0_20] : memref<16x128xf32, #tpu.memory_space<vmem>>, vector<16x128xf32>
    tpu.vector_store %arg8[%c0_19, %c0_20], %29 {strides = array<i32>} : memref<16x128xf32, #tpu.memory_space<vmem>>, vector<16x128xf32>,
    return
  }
}

</mosaic_0001>

<bundles_post_ra>
// kernel: tpu_custom_call.1
= control target key start
LH: loop header
LB: loop body
LE: loop exit
PB: predicated region body
PF: predicated region fallthrough
CT: control target
= control target key end

     0   :  { %13 = vsyncpa [#allocation3], 0  ;;  %s853_s0 = inlined_call_operand.vmem [shape: f32[16,16], index: 0, kind: input, shape index: {}]   ;;  %s854_s1 = inlined_call_operand.vmem [shape: f32[16,1], index: 1, kind: input, shape index: {}]   ;;  %s855_s2 = inlined_call_operand.hbm [shape: f32[1,128], index: 2, kind: input, shape index: {}]   ;;  %s856_s3 = inlined_call_operand.hbm [shape: f32[1,128], index: 3, kind: input, shape index: {}]   ;;  %s857_s4 = inlined_call_operand.hbm [shape: f32[1,128], index: 4, kind: input, shape index: {}]   ;;  %s858_s5 = inlined_call_operand.vmem [shape: f32[16,128], index: 5, kind: input, shape index: {}]   ;;  %s859_s6 = inlined_call_operand.hbm [shape: f32[16,128], index: 6, kind: input, shape index: {}]   ;;  %s860_s7 = inlined_call_operand.vmem [shape: f32[1,128], index: 7, kind: input, shape index: {}]   ;;  %s861_s8 = inlined_call_operand.hbm [shape: f32[16,128], index: 8, kind: output, shape index: {}]  }
   0x1   :  { %14 = vsyncpa [#allocation6], 0 }
   0x2   :  { %15 = vsyncpa [#allocation9], 0 }
   0x3   :  { %16 = vsyncpa [#allocation4], 0  ;;  %s698_s27 = smov [#allocation5]   ;;  %s699_s29 = smov [#allocation2]  }
   0x4   :  { %s37_s28 = sshll.u32 %s698_s27, 4  ;;  %s27_s30 = sshll.u32 %s699_s29, 4  ;;  %s38_s28 = int_to_ptr.vmem [resolvable:$true] %s37_s28  ;;  %s28_s30 = int_to_ptr.vmem [resolvable:$true] %s27_s30 }
   0x5   :  { %s580_s11 = scalar_lea.hbm %s856_s3, 16 }
   0x6   :  { %p581_p0 = scmp.ne.s32.totalorder %s856_s3, %s580_s11  ;;  %p584_p1 = scmp.lt.u32.totalorder %s580_s11, %s856_s3 }
   0x8   :  { %p586_p2 = pnand %p584_p1, %p581_p0 }
   0xa   :  { %589 = shalt.err (!%p586_p2)
}
   0xb   :  { %s590_s16 = scalar_lea.vmem %s38_s28, 16  ;;  %s594_s17 = scalar_lea.vmem %s38_s28, 32 }
   0xc   :  { %p591_p3 = scmp.ne.s32.totalorder %s38_s28, %s590_s16  ;;  %p595_p4 = scmp.lt.s32.totalorder %s38_s28, %s38_s28 }
   0xd   :  { %p596_p5 = scmp.lt.s32.totalorder %s594_s17, %s590_s16 }
   0xf   :  { %p597_p6 = por %p596_p5, %p595_p4 }
  0x11   :  { %p598_p7 = pnand %p597_p6, %p591_p3 }
  0x13   :  { %601 = shalt.err (!%p598_p7)
}
  0x14   :  { %40 = dma.hbm_to_vmem [thread:$0]  %s856_s3, 16, %s38_s28, [#allocation6]  }
  0x15   :  { %s602_s22 = scalar_lea.hbm %s855_s2, 16 }
  0x16   :  { %p603_p8 = scmp.ne.s32.totalorder %s855_s2, %s602_s22  ;;  %p606_p9 = scmp.lt.u32.totalorder %s602_s22, %s855_s2 }
  0x18   :  { %p608_p10 = pnand %p606_p9, %p603_p8 }
  0x1a   :  { %611 = shalt.err (!%p608_p10)
}
  0x1b   :  { %s612_s27 = scalar_lea.vmem %s28_s30, 16  ;;  %s616_s29 = scalar_lea.vmem %s28_s30, 32 }
  0x1c   :  { %p613_p11 = scmp.ne.s32.totalorder %s28_s30, %s612_s27  ;;  %p617_p12 = scmp.lt.s32.totalorder %s28_s30, %s28_s30 }
  0x1d   :  { %p618_p13 = scmp.lt.s32.totalorder %s616_s29, %s612_s27 }
  0x1f   :  { %p619_p0 = por %p618_p13, %p617_p12 }
  0x21   :  { %p620_p1 = pnand %p619_p0, %p613_p11 }
  0x23   :  { %623 = shalt.err (!%p620_p1)
}
  0x24   :  { %30 = dma.hbm_to_vmem [thread:$0]  %s855_s2, 16, %s28_s30, [#allocation3]  }
  0x25   :  { %s700_s9 = smov [#allocation7]   ;;  %s701_s11 = smov [#allocation8]  }
  0x26   :  { %s47_s10 = sshll.u32 %s700_s9, 4  ;;  %s58_s12 = sshll.u32 %s701_s11, 4  ;;  %s48_s10 = int_to_ptr.vmem [resolvable:$true] %s47_s10  ;;  %s775_s12 = int_to_ptr.vmem [resolvable:$true] %s58_s12 }
  0x27   :  { %s624_s15 = scalar_lea.hbm %s857_s4, 16 }
  0x28   :  { %p625_p2 = scmp.ne.s32.totalorder %s857_s4, %s624_s15  ;;  %p628_p3 = scmp.lt.u32.totalorder %s624_s15, %s857_s4 }
  0x2a   :  { %p630_p4 = pnand %p628_p3, %p625_p2 }
  0x2c   :  { %633 = shalt.err (!%p630_p4)
}
  0x2d   :  { %s634_s2 = scalar_lea.vmem %s48_s10, 16  ;;  %s638_s30 = scalar_lea.vmem %s48_s10, 32 }
  0x2e   :  { %p635_p5 = scmp.ne.s32.totalorder %s48_s10, %s634_s2  ;;  %p639_p6 = scmp.lt.s32.totalorder %s48_s10, %s48_s10 }
  0x2f   :  { %p640_p7 = scmp.lt.s32.totalorder %s638_s30, %s634_s2 }
  0x31   :  { %p641_p8 = por %p640_p7, %p639_p6 }
  0x33   :  { %p642_p9 = pnand %p641_p8, %p635_p5 }
  0x35   :  { %645 = shalt.err (!%p642_p9)
}
  0x36   :  { %50 = dma.hbm_to_vmem [thread:$0]  %s857_s4, 16, %s48_s10, [#allocation6]  }
  0x37   :  { %s646_s24 = scalar_lea.hbm %s859_s6, 256 }
  0x38   :  { %p647_p10 = scmp.ne.s32.totalorder %s859_s6, %s646_s24  ;;  %p650_p11 = scmp.lt.u32.totalorder %s646_s24, %s859_s6 }
  0x3a   :  { %p652_p12 = pnand %p650_p11, %p647_p10 }
  0x3c   :  { %655 = shalt.err (!%p652_p12)
}
  0x3d   :  { %s656_s3 = scalar_lea.vmem %s775_s12, 256  ;;  %p661_p0 = scmp.lt.s32.totalorder %s775_s12, %s775_s12 }
  0x3e   :  { %p657_p13 = scmp.ne.s32.totalorder %s775_s12, %s656_s3  ;;  %p662_p1 = scmp.lt.s32.totalorder %s656_s3, %s656_s3 }
  0x40   :  { %p663_p2 = por %p662_p1, %p661_p0 }
  0x42   :  { %p664_p3 = pnand %p663_p2, %p657_p13 }
  0x44   :  { %667 = shalt.err (!%p664_p3)
}
  0x45   :  { %s702_s4 = smov 128   ;;  %s703_s28 = smov 8  }
  0x46   :  { %64 = dma.hbm_to_vmem [thread:$0]  %s859_s6, 256, %s775_s12, [#allocation9], %s702_s4, %s702_s4, %s703_s28  }
  0x47   :  { %690 = dma.done.wait [#allocation3], 16  }
  0x48   :  { %691 = vsyncadd [#allocation3], 4294967280 }
  0x49   :  { %692 = dma.done.wait [#allocation6], 32  }
  0x4a   :  { %693 = vsyncadd [#allocation6], 4294967264 }
  0x4b   :  { %694 = dma.done.wait [#allocation9], 256  }
  0x4c   :  { %695 = vsyncadd [#allocation9], 4294967040  ;;  %v704_v0 = vmov 0   ;;  %v81_v1 = vld [vmem:[%s854_s1] sm:$0xff]  ;;  %v82_v2 = vld [vmem:[%s854_s1 + $0x8] sm:$0xff]  ;;  %vm111_vm0 = vcmask 130048  }
  0x4d   :  { %571 = vset.pattern.permute.xlu0 %v704_v0  ;;  %v79_v3 = vld [vmem:[%s853_s0] sm:$0xff]  ;;  %v80_v10 = vld [vmem:[%s853_s0 + $0x8] sm:$0xff]  ;;  %s705_s20 = smov [#allocation10]  }
  0x4e   :  { %86 = vperm.xlu0 %571, %v81_v1   ;;  %521 = vmatprep.mubr.msk.f32.mxu1 %vm111_vm0, %v79_v3  ;;  %v487_v5 = vld [vmem:[#allocation5] ss:$0 sm:$0xff]  ;;  %v293_v11 = vld [vmem:[#allocation8] sm:$0xff]  ;;  %v294_v12 = vld [vmem:[#allocation8 + $0x8] sm:$0xff]  ;;  %s473_s21 = sshll.u32 %s705_s20, 4  ;;  %s474_s21 = int_to_ptr.vmem [resolvable:$true] %s473_s21 }
  0x4f   :  { %v553_v13 = vpack.c.bf16 %v294_v12, %v293_v11  ;;  %v488_v14 = vld [vmem:[#allocation2] ss:$0 sm:$0xff]  ;;  %v491_v17 = vld [vmem:[#allocation7] ss:$0 sm:$0xff]  ;;  %v292_v34 = vld [vmem:[%s858_s5 + $0x8] sm:$0xff]  ;;  %p673_p5 = scmp.lt.s32.totalorder %s474_s21, %s474_s21 }
  0x50   :  { %v291_v33 = vld [vmem:[%s858_s5] sm:$0xff]  ;;  %s668_s5 = scalar_lea.vmem %s474_s21, 256 }
  0x51   :  { %554 = vmatprep.subr.bf16.mxu0 %v553_v13  ;;  %v557_v35 = vpack.c.bf16 %v292_v34, %v291_v33  ;;  %v500_v38 = vld [vmem:[%s860_s7] ss:$0 sm:$0xff]  ;;  %p669_p4 = scmp.ne.s32.totalorder %s474_s21, %s668_s5  ;;  %p674_p6 = scmp.lt.s32.totalorder %s668_s5, %s668_s5 }
  0x52   :  { %91 = vperm.xlu0 %571, %v82_v2   ;;  %556 = vmatpush3.bf16.msra.mxu0 %v553_v13 }
  0x53   :  { %558 = vmatprep.subr.bf16.mxu0 %v557_v35  ;;  %p675_p7 = por %p674_p6, %p673_p5 }
  0x55   :  { %p676_p8 = pnand %p675_p7, %p669_p4 }
  0xcd   :  { %v87_v4 = vpop.permute.xlu0 %86 }
  0xce   :  { %v100_v7 = vmul.f32 %v487_v5, %v87_v4  ;;  %v109_v18 = vmul.f32 %v488_v14, %v87_v4 }
  0xd1   :  { %v92_v6 = vpop.permute.xlu0 %91 }
  0xd2   :  { %v101_v8 = vmul.f32 %v487_v5, %v92_v6  ;;  %v110_v15 = vmul.f32 %v488_v14, %v92_v6 }
  0xd4   :  { %v545_v9 = vpack.c.bf16 %v101_v8, %v100_v7 }
  0xd6   :  { %546 = vmatprep.subr.bf16.mxu1 %v545_v9 }
  0xd7   :  { %548 = vmatpush3.bf16.msra.mxu1 %v545_v9 }
  0xda   :  { %522 = vmatmul.mubr.msk.f32.vlgmr.msra.gmra.mrb[0].mxu1 %vm111_vm0, %v80_v10 }
  0xdb   :  { %528 = vmatprep.mubr.msk.f32.mxu1 %vm111_vm0, %v79_v3 }
 0x1ad   :  { %v523_v16 = vpop.f32.mrb[0].mxu1 }
 0x1ae   :  { %v194_v19 = vadd.f32 %v523_v16, %v110_v15  ;;  %v184_v20 = vpop.f32.mrb[1].mxu1 }
 0x1af   :  { %v193_v21 = vadd.f32 %v184_v20, %v109_v18 }
 0x1b0   :  { %v203_v22 = vadd.f32 %v491_v17, %v194_v19 }
 0x1b1   :  { %v202_v23 = vadd.f32 %v491_v17, %v193_v21 }
 0x1b2   :  { %v493_v24 = vmul.f32 -1.442695, %v203_v22 }
 0x1b3   :  { %v492_v25 = vmul.f32 -1.442695, %v202_v23 }
 0x1b4   :  { %572 = vpow2.f32 %v493_v24 }
 0x1b5   :  { %574 = vpow2.f32 %v492_v25 }
 0x1be   :  { %v573_v26 = vpop.eup %572 }
 0x1bf   :  { %v575_v27 = vpop.eup %574  ;;  %v211_v28 = vadd.f32 1.0, %v573_v26 }
 0x1c0   :  { %v210_v29 = vadd.f32 1.0, %v575_v27 }
 0x1c1   :  { %576 = vrcp.f32 %v211_v28 }
 0x1c2   :  { %578 = vrcp.f32 %v210_v29 }
 0x1cb   :  { %v577_v30 = vpop.eup %576 }
 0x1cc   :  { %v579_v31 = vpop.eup %578 }
 0x1cd   :  { %v549_v32 = vpack.c.bf16 %v577_v30, %v579_v31 }
 0x1cf   :  { %550 = vmatprep.subr.bf16.mxu1 %v549_v32 }
 0x1d0   :  { %552 = vmatpush3.bf16.msra.mxu1 %v549_v32 }
 0x1d3   :  { %529 = vmatmul.mubr.msk.f32.vlgmr.msra.gmra.mrb[2].mxu1 %vm111_vm0, %v80_v10 }
 0x2a6   :  { %v530_v36 = vpop.f32.mrb[2].mxu1 }
 0x2a7   :  { %v282_v37 = vpop.f32.mrb[3].mxu1 }
 0x2a8   :  { %535 = vmatprep.mubr.msk.f32.mxu0 %vm111_vm0, %v282_v37 }
 0x2a9   :  { %536 = vmatmul.mubr.msk.f32.vlgmr.msra.gmra.mrb[0].mxu0 %vm111_vm0, %v530_v36 }
 0x2aa   :  { %560 = vmatpush3.bf16.msra.mxu0 %v557_v35  ;;  %542 = vmatprep.mubr.msk.f32.mxu0 %vm111_vm0, %v579_v31 }
 0x2b1   :  { %543 = vmatmul.mubr.msk.f32.vlgmr.msra.gmra.mrb[0].mxu0 %vm111_vm0, %v577_v30 }
 0x384   :  { %v544_v39 = vpop.f32.mrb[0].mxu0 }
 0x385   :  { %v465_v40 = vadd.f32 %v544_v39, %v500_v38  ;;  %v448_v41 = vpop.f32.mrb[1].mxu0 }
 0x386   :  { %v464_v42 = vadd.f32 %v500_v38, %v448_v41 }
 0x387   :  { %467 = vst [vmem:[#allocation10 + $0x8] sm:$0xff] %v465_v40 }
 0x388   :  { %466 = vst [vmem:[#allocation10] sm:$0xff] %v464_v42 }
 0x389   :  { %679 = shalt.err (!%p676_p8)
}
 0x38a   :  { %s680_s7 = scalar_lea.hbm %s861_s8, 256 }
 0x38b   :  { %p681_p9 = scmp.ne.s32.totalorder %s861_s8, %s680_s7  ;;  %p684_p10 = scmp.lt.u32.totalorder %s680_s7, %s861_s8 }
 0x38d   :  { %p686_p11 = pnand %p684_p10, %p681_p9 }
 0x38f   :  { %689 = shalt.err (!%p686_p11)
}
 0x390   :  { %479 = dma.vmem_to_hbm [thread:$0]  %s474_s21, 256, %s861_s8, [#allocation4], %s702_s4, %s702_s4, %s703_s28  }
 0x391   :  { %696 = dma.done.wait [#allocation4], 256  }
 0x392   :  { %697 = vsyncadd [#allocation4], 4294967040 }
 0x393   :  { %483 = vsyncpa [#allocation3], 1 }
 0x394   :  { %484 = vsyncpa [#allocation6], 1 }
 0x395   :  { %485 = vsyncpa [#allocation9], 1 }
 0x396   :  { %486 = vsyncpa [#allocation4], 1 }

</bundles_post_ra>
